<compile_context>
chip_gen: v5e
topology: v5e:2x2
jax: 0.10.0
libtpu: 0.0.40
codegen_flags: <defaults>
</compile_context>

<pallas_src>
import jax
import jax.numpy as jnp
from jax.experimental import pallas as pl
from jax.experimental.pallas import tpu as pltpu

LANE = 128   # lane-dense padded width for the hidden activations (MXU friendly)
F_IN = 10
F_OUT = 5    # true model output width; kernel writes exactly this many lanes


def mlp_kernel(x_ref, w1_ref, b1_ref, w2_ref, b2_ref, w3_ref, b3_ref, o_ref):
    # layer1 + relu (MXU matmul, f32 accumulate; bias/relu on the f32 acc)
    h1 = jnp.dot(x_ref[...], w1_ref[...], preferred_element_type=jnp.float32)
    h1 = jnp.maximum(h1 + b1_ref[...], 0.0).astype(w2_ref.dtype)
    # layer2 + relu
    h2 = jnp.dot(h1, w2_ref[...], preferred_element_type=jnp.float32)
    h2 = jnp.maximum(h2 + b2_ref[...], 0.0).astype(w3_ref.dtype)
    # layer3 (no activation) — narrow (tile_b, 5) store: only useful bytes hit HBM
    o_ref[...] = (
        jnp.dot(h2, w3_ref[...], preferred_element_type=jnp.float32) + b3_ref[...]
    )


def _round_up(n, m):
    return ((n + m - 1) // m) * m


def _pad2d(a, rows, cols):
    r, c = a.shape
    return jnp.pad(a, ((0, rows - r), (0, cols - c)))


def pad_params(params, *, use_bf16=False):
    """One-time padding of weights/biases (call once, reuse across forwards).

    Hidden layers are zero-padded to 128 lanes (MXU-friendly, provably leaves
    the logical result unchanged). The final layer keeps its true 5 output
    columns so the kernel's HBM writeback is only the useful bytes.
    Weights may optionally be cast to bf16 (f32 accumulation in-kernel).
    """
    wdt = jnp.bfloat16 if use_bf16 else jnp.float32
    return dict(
        w1=_pad2d(params["w1"], F_IN, LANE).astype(wdt),   # (10, 128)
        b1=_pad2d(params["b1"], 1, LANE),                   # (1, 128) f32
        w2=_pad2d(params["w2"], LANE, LANE).astype(wdt),    # (128, 128)
        b2=_pad2d(params["b2"], 1, LANE),                   # (1, 128) f32
        w3=_pad2d(params["w3"], LANE, F_OUT).astype(wdt),   # (128, 5)
        b3=params["b3"],                                    # (1, 5)   f32
    )


def simple_model_forward(x, padded, *, tile_b=4096, use_bf16=False):
    """x: (B, 10) float32. `padded`: output of pad_params (PyTorch nn.Linear
    semantics y = x @ W + b, weights stored as (in, out))."""
    B, f_in = x.shape
    assert f_in == F_IN

    if use_bf16:
        x = x.astype(jnp.bfloat16)

    # tile_b must be a multiple of 8 (BlockSpec (8,128) constraint); also cap it
    # so moderate batches split into >=2 grid steps (v7x has 2 TensorCores).
    tile_b = _round_up(max(8, tile_b), 8)
    half_b = _round_up(max(8, _round_up(B, 8) // 2), 8)
    tile_b = min(tile_b, half_b)

    b_padded = _round_up(B, tile_b)
    if b_padded != B:
        x = jnp.pad(x, ((0, b_padded - B), (0, 0)))
    grid = (b_padded // tile_b,)

    # Weights/biases: full-array blocks, constant index_map -> loaded once,
    # resident in VMEM across all batch tiles.
    const = lambda arr: pl.BlockSpec(arr.shape, lambda i: (0, 0))
    w1, b1, w2, b2, w3, b3 = (padded[k] for k in ("w1", "b1", "w2", "b2", "w3", "b3"))

    out = pl.pallas_call(
        mlp_kernel,
        out_shape=jax.ShapeDtypeStruct((b_padded, F_OUT), jnp.float32),
        grid=grid,
        in_specs=[
            pl.BlockSpec((tile_b, F_IN), lambda i: (i, 0)),   # x, tiled over batch
            const(w1), const(b1), const(w2), const(b2), const(w3), const(b3),
        ],
        out_specs=pl.BlockSpec((tile_b, F_OUT), lambda i: (i, 0)),
        compiler_params=pltpu.CompilerParams(
            dimension_semantics=("parallel",),  # megacore sharding on v7x
            # NOTE: at tile_b<=4096 the default scoped-VMEM limit is enough on
            # every generation; raise vmem_limit_bytes only for 8k-16k tiles
            # on v5e/v6e.
        ),
    )(x, w1, b1, w2, b2, w3, b3)

    # Output is already only 5 lanes wide; slice only the batch padding off.
    # NOTE: batch-padded rows are NOT zero (bias propagates through ReLU), so
    # never reduce over them before this slice.
    return out if b_padded == B else out[:B]


def init_params(key):
    """Deterministic init mirroring PyTorch nn.Linear (uniform ±1/sqrt(fan_in)).
    Weights stored as (in_features, out_features); biases as (1, out_features)."""
    def linear(key, fan_in, fan_out):
        kw, kb = jax.random.split(key)
        bound = 1.0 / jnp.sqrt(fan_in)
        w = jax.random.uniform(kw, (fan_in, fan_out), jnp.float32, -bound, bound)
        b = jax.random.uniform(kb, (1, fan_out), jnp.float32, -bound, bound)
        return w, b

    k1, k2, k3 = jax.random.split(key, 3)
    w1, b1 = linear(k1, 10, 20)
    w2, b2 = linear(k2, 20, 15)
    w3, b3 = linear(k3, 15, 5)
    return dict(w1=w1, b1=b1, w2=w2, b2=b2, w3=w3, b3=b3)


if __name__ == "__main__":
    key = jax.random.PRNGKey(0)
    pkey, xkey = jax.random.split(key)
    params = init_params(pkey)
    padded = pad_params(params)           # one-time param prep (f32 path)

    B = 32
    x = jax.random.normal(xkey, (B, 10), jnp.float32)

    # Default tile_b=4096 is capped to B/2 here, so the 2-step batch grid
    # (and v7x core split) is actually exercised at this small demo size.
    out = simple_model_forward(x, padded)
    out = jax.block_until_ready(out)

    # sanity check against plain-JAX reference
    h1 = jnp.maximum(x @ params["w1"] + params["b1"], 0.0)
    h2 = jnp.maximum(h1 @ params["w2"] + params["b2"], 0.0)
    ref = h2 @ params["w3"] + params["b3"]
    assert out.shape == (B, 5)
    assert jnp.allclose(out, ref, atol=1e-5), "mismatch vs reference"

    print("KERNEL_OK")
</pallas_src>

<mosaic_0001>
module attributes {stable_mosaic.version = 11 : i64} {
  func.func @mlp_kernel(%arg0: i32, %arg1: memref<16x10xf32, #tpu.memory_space<vmem>>, %arg2: memref<10x128xf32, #tpu.memory_space<vmem>>, %arg3: memref<1x128xf32, #tpu.memory_space<vmem>>, %arg4: memref<128x128xf32, #tpu.memory_space<vmem>>, %arg5: memref<1x128xf32, #tpu.memory_space<vmem>>, %arg6: memref<128x5xf32, #tpu.memory_space<vmem>>, %arg7: memref<1x5xf32, #tpu.memory_space<vmem>>, %arg8: memref<16x5xf32, #tpu.memory_space<vmem>>) attributes {dimension_semantics = [#tpu.dimension_semantics<parallel>], iteration_bounds = array<i64: 2>, scalar_prefetch = 0 : i64, scratch_operands = 0 : i64, tpu.core_type = #tpu.core_type<tc>, window_params = [{transform_indices = @transform_0, window_bounds = array<i64: 16, 10>}, {pipeline_mode = #tpu.pipeline_mode<synchronous>, transform_indices = @transform_1, window_bounds = array<i64: 10, 128>}, {pipeline_mode = #tpu.pipeline_mode<synchronous>, transform_indices = @transform_2, window_bounds = array<i64: 1, 128>}, {pipeline_mode = #tpu.pipeline_mode<synchronous>, transform_indices = @transform_3, window_bounds = array<i64: 128, 128>}, {pipeline_mode = #tpu.pipeline_mode<synchronous>, transform_indices = @transform_4, window_bounds = array<i64: 1, 128>}, {pipeline_mode = #tpu.pipeline_mode<synchronous>, transform_indices = @transform_5, window_bounds = array<i64: 128, 5>}, {pipeline_mode = #tpu.pipeline_mode<synchronous>, transform_indices = @transform_6, window_bounds = array<i64: 1, 5>}, {transform_indices = @transform_7, window_bounds = array<i64: 16, 5>}]} {
    %c0 = arith.constant 0 : index
    %c0_0 = arith.constant 0 : index
    %0 = vector.load %arg1[%c0, %c0_0] : memref<16x10xf32, #tpu.memory_space<vmem>>, vector<16x10xf32>
    %c0_1 = arith.constant 0 : index
    %c0_2 = arith.constant 0 : index
    %1 = vector.load %arg2[%c0_1, %c0_2] : memref<10x128xf32, #tpu.memory_space<vmem>>, vector<10x128xf32>
    %cst = arith.constant dense<0.000000e+00> : vector<16x128xf32>
    %2 = tpu.matmul %0, %1, %cst {dimension_numbers = #tpu.dot_dimension_numbers<[1], [0], [0], [1], [0, 0, 1, 1], [], []>} : vector<16x10xf32>, vector<10x128xf32>, vector<16x128xf32> -> vector<16x128xf32>
    %c0_3 = arith.constant 0 : index
    %c0_4 = arith.constant 0 : index
    %3 = vector.load %arg3[%c0_3, %c0_4] : memref<1x128xf32, #tpu.memory_space<vmem>>, vector<1x128xf32>
    %4 = vector.broadcast %3 : vector<1x128xf32> to vector<16x128xf32>
    %5 = arith.addf %2, %4 : vector<16x128xf32>
    %cst_5 = arith.constant 0.000000e+00 : f32
    %6 = vector.broadcast %cst_5 : f32 to vector<16x128xf32>
    %7 = arith.maximumf %5, %6 : vector<16x128xf32>
    %c0_6 = arith.constant 0 : index
    %c0_7 = arith.constant 0 : index
    %8 = vector.load %arg4[%c0_6, %c0_7] : memref<128x128xf32, #tpu.memory_space<vmem>>, vector<128x128xf32>
    %cst_8 = arith.constant dense<0.000000e+00> : vector<16x128xf32>
    %9 = tpu.matmul %7, %8, %cst_8 {dimension_numbers = #tpu.dot_dimension_numbers<[1], [0], [0], [1], [0, 0, 1, 1], [], []>} : vector<16x128xf32>, vector<128x128xf32>, vector<16x128xf32> -> vector<16x128xf32>
    %c0_9 = arith.constant 0 : index
    %c0_10 = arith.constant 0 : index
    %10 = vector.load %arg5[%c0_9, %c0_10] : memref<1x128xf32, #tpu.memory_space<vmem>>, vector<1x128xf32>
    %11 = vector.broadcast %10 : vector<1x128xf32> to vector<16x128xf32>
    %12 = arith.addf %9, %11 : vector<16x128xf32>
    %cst_11 = arith.constant 0.000000e+00 : f32
    %13 = vector.broadcast %cst_11 : f32 to vector<16x128xf32>
    %14 = arith.maximumf %12, %13 : vector<16x128xf32>
    %c0_12 = arith.constant 0 : index
    %c0_13 = arith.constant 0 : index
    %15 = vector.load %arg6[%c0_12, %c0_13] : memref<128x5xf32, #tpu.memory_space<vmem>>, vector<128x5xf32>
    %cst_14 = arith.constant dense<0.000000e+00> : vector<16x5xf32>
    %16 = tpu.matmul %14, %15, %cst_14 {dimension_numbers = #tpu.dot_dimension_numbers<[1], [0], [0], [1], [0, 0, 1, 1], [], []>} : vector<16x128xf32>, vector<128x5xf32>, vector<16x5xf32> -> vector<16x5xf32>
    %c0_15 = arith.constant 0 : index
    %c0_16 = arith.constant 0 : index
    %17 = vector.load %arg7[%c0_15, %c0_16] : memref<1x5xf32, #tpu.memory_space<vmem>>, vector<1x5xf32>
    %18 = vector.broadcast %17 : vector<1x5xf32> to vector<16x5xf32>
    %19 = arith.addf %16, %18 : vector<16x5xf32>
    %c0_17 = arith.constant 0 : index
    %c0_18 = arith.constant 0 : index
    %20 = vector.load %arg8[%c0_17, %c0_18] : memref<16x5xf32, #tpu.memory_space<vmem>>, vector<16x5xf32>
    tpu.vector_store %arg8[%c0_17, %c0_18], %19 {strides = array<i32>} : memref<16x5xf32, #tpu.memory_space<vmem>>, vector<16x5xf32>,
    return
  }
  func.func @transform_0(%arg0: i32) -> (i32, i32) {
    %c0_i32 = arith.constant 0 : i32
    %c0_i32_0 = arith.constant 0 : i32
    return %arg0, %c0_i32 : i32, i32
  }
  func.func @transform_1(%arg0: i32) -> (i32, i32) {
    %c0_i32 = arith.constant 0 : i32
    %c0_i32_0 = arith.constant 0 : i32
    %c0_i32_1 = arith.constant 0 : i32
    return %c0_i32, %c0_i32_0 : i32, i32
  }
  func.func @transform_2(%arg0: i32) -> (i32, i32) {
    %c0_i32 = arith.constant 0 : i32
    %c0_i32_0 = arith.constant 0 : i32
    %c0_i32_1 = arith.constant 0 : i32
    return %c0_i32, %c0_i32_0 : i32, i32
  }
  func.func @transform_3(%arg0: i32) -> (i32, i32) {
    %c0_i32 = arith.constant 0 : i32
    %c0_i32_0 = arith.constant 0 : i32
    %c0_i32_1 = arith.constant 0 : i32
    return %c0_i32, %c0_i32_0 : i32, i32
  }
  func.func @transform_4(%arg0: i32) -> (i32, i32) {
    %c0_i32 = arith.constant 0 : i32
    %c0_i32_0 = arith.constant 0 : i32
    %c0_i32_1 = arith.constant 0 : i32
    return %c0_i32, %c0_i32_0 : i32, i32
  }
  func.func @transform_5(%arg0: i32) -> (i32, i32) {
    %c0_i32 = arith.constant 0 : i32
    %c0_i32_0 = arith.constant 0 : i32
    %c0_i32_1 = arith.constant 0 : i32
    return %c0_i32, %c0_i32_0 : i32, i32
  }
  func.func @transform_6(%arg0: i32) -> (i32, i32) {
    %c0_i32 = arith.constant 0 : i32
    %c0_i32_0 = arith.constant 0 : i32
    %c0_i32_1 = arith.constant 0 : i32
    return %c0_i32, %c0_i32_0 : i32, i32
  }
  func.func @transform_7(%arg0: i32) -> (i32, i32) {
    %c0_i32 = arith.constant 0 : i32
    %c0_i32_0 = arith.constant 0 : i32
    return %arg0, %c0_i32 : i32, i32
  }
}

</mosaic_0001>

<bundles_post_ra>
// kernel: tpu_custom_call.1
= control target key start
LH: loop header
LB: loop body
LE: loop exit
PB: predicated region body
PF: predicated region fallthrough
CT: control target
= control target key end

     0   :  { %s578_s24 = smov 0   ;;  %s715_s0 = inlined_call_operand.vmem [shape: f32[32,10], index: 0, kind: input, shape index: {}]   ;;  %s716_s1 = inlined_call_operand.vmem [shape: f32[10,128], index: 1, kind: input, shape index: {}]   ;;  %s717_s2 = inlined_call_operand.vmem [shape: f32[1,128], index: 2, kind: input, shape index: {}]   ;;  %s718_s3 = inlined_call_operand.vmem [shape: f32[128,128], index: 3, kind: input, shape index: {}]   ;;  %s719_s4 = inlined_call_operand.vmem [shape: f32[1,128], index: 4, kind: input, shape index: {}]   ;;  %s720_s5 = inlined_call_operand.vmem [shape: f32[128,5], index: 5, kind: input, shape index: {}]   ;;  %s721_s6 = inlined_call_operand.vmem [shape: f32[1,5], index: 6, kind: input, shape index: {}]   ;;  %s722_s7 = inlined_call_operand.vmem [shape: f32[32,5], index: 7, kind: output, shape index: {}]  }
   0x1 LB: > { %s473_s25 = sadd.s32 4294967295, %s536_s24   ;;  %p477_p0 = scmp.ge.s32.totalorder %s536_s24, 1  ;;  %s536_s24 = sphi %s578_s24, %s17_s24  }
   0x2   : > { %p238_p1 = scmp.lt.s32.totalorder %s536_s24, 3 }
   0x4   : > { %p239_p2 = pnand %p477_p0, %p238_p1 }
   0x5   : > { %s478_s30 = sshll.u32 (!%p239_p2), %s473_s25, 1 }
   0x6   : > { %242 = sbr.rel (%p239_p2) target bundleno = 424 (0x1a8), region = 48  ;;  %p271_p3 = scmp.lt.s32.totalorder (!%p239_p2), %s478_s30, 3 }
   0xb   : > { %v285_v0 = vld [vmem:[%s716_s1 + $0x8] sm:$0x3]  ;;  %vm297_vm0 = vcmask 1041408   ;;  %v284_v1 = vld [vmem:[%s716_s1] sm:$0xff]  ;;  %v341_v2 = vld [vmem:[%s718_s3 + $0x78] sm:$0xff]  ;;  %s724_s30 = smov (!%p271_p3, %s478_s30), 3 }
   0xc   : > { %482 = vmatpush.msk.msra.mxu0 %vm297_vm0, %v285_v0  ;;  %v340_v3 = vld [vmem:[%s718_s3 + $0x70] sm:$0xff]  ;;  %346 = vmatpush.msra.mxu1 %v341_v2  ;;  %v339_v4 = vld [vmem:[%s718_s3 + $0x68] sm:$0xff]  ;;  %s479_s14 = sshll.u32 %s724_s30, 3  ;;  %vm290_vm1 = vcmask 80896   ;;  %v338_v5 = vld [vmem:[%s718_s3 + $0x60] sm:$0xff]  ;;  %vm414_vm2 = vcmask 39936  }
   0xd   : > { %487 = vmatpush.msra.mxu3 %v341_v2  ;;  %s274_s19 = scalar_lea.vmem %s715_s0, %s479_s14  ;;  %v337_v7 = vld [vmem:[%s718_s3 + $0x58] sm:$0xff]  ;;  %v336_v8 = vld [vmem:[%s718_s3 + $0x50] sm:$0xff]  ;;  %v335_v9 = vld [vmem:[%s718_s3 + $0x48] sm:$0xff]  ;;  %s280_s25 = scalar_lea.vmem %s722_s7, %s479_s14 }
   0xe   : > { %316 = vmatpush.msra.mxu0 %v284_v1  ;;  %347 = vmatpush.msra.mxu1 %v340_v3  ;;  %v282_v6 = vld [vmem:[%s274_s19] sm:$0xff]  ;;  %v283_v10 = vld [vmem:[%s274_s19 + $0x8] sm:$0xff]  ;;  %v333_v12 = vld [vmem:[%s718_s3 + $0x38] sm:$0xff] }
   0xf   : > { %488 = vmatpush.msra.mxu3 %v340_v3  ;;  %483 = vmatmul.msk.f32.vlgmr.msra.gmra.mxu0 %vm290_vm1, %v282_v6  ;;  %v334_v11 = vld [vmem:[%s718_s3 + $0x40] sm:$0xff]  ;;  %v332_v13 = vld [vmem:[%s718_s3 + $0x30] sm:$0xff]  ;;  %v331_v14 = vld [vmem:[%s718_s3 + $0x28] sm:$0xff] }
  0x10   : > { %348 = vmatpush.msra.mxu1 %v339_v4  ;;  %v330_v15 = vld [vmem:[%s718_s3 + $0x20] sm:$0xff]  ;;  %v329_v16 = vld [vmem:[%s718_s3 + $0x18] sm:$0xff]  ;;  %v328_v17 = vld [vmem:[%s718_s3 + $0x10] sm:$0xff] }
  0x11   : > { %489 = vmatpush.msra.mxu3 %v339_v4  ;;  %v327_v18 = vld [vmem:[%s718_s3 + $0x8] sm:$0xff]  ;;  %v326_v19 = vld [vmem:[%s718_s3] sm:$0xff]  ;;  %v386_v20 = vld [vmem:[%s720_s5 + $0x78] sm:$0xff] }
  0x12   : > { %349 = vmatpush.msra.mxu1 %v338_v5  ;;  %v385_v21 = vld [vmem:[%s720_s5 + $0x70] sm:$0xff]  ;;  %391 = vmatpush.msrb.mxu0 %v386_v20  ;;  %v384_v22 = vld [vmem:[%s720_s5 + $0x68] sm:$0xff]  ;;  %v383_v23 = vld [vmem:[%s720_s5 + $0x60] sm:$0xff] }
  0x13   : > { %490 = vmatpush.msra.mxu3 %v338_v5  ;;  %503 = vmatpush.msra.mxu2 %v386_v20  ;;  %v382_v24 = vld [vmem:[%s720_s5 + $0x58] sm:$0xff]  ;;  %v381_v25 = vld [vmem:[%s720_s5 + $0x50] sm:$0xff]  ;;  %v380_v26 = vld [vmem:[%s720_s5 + $0x48] sm:$0xff] }
  0x14   : > { %350 = vmatpush.msra.mxu1 %v337_v7  ;;  %392 = vmatpush.msrb.mxu0 %v385_v21  ;;  %v379_v27 = vld [vmem:[%s720_s5 + $0x40] sm:$0xff]  ;;  %v378_v28 = vld [vmem:[%s720_s5 + $0x38] sm:$0xff]  ;;  %v377_v30 = vld [vmem:[%s720_s5 + $0x30] sm:$0xff] }
  0x15   : > { %491 = vmatpush.msra.mxu3 %v337_v7  ;;  %504 = vmatpush.msra.mxu2 %v385_v21  ;;  %v527_v29 = vld [vmem:[%s717_s2] ss:$0 sm:$0xff]  ;;  %v376_v31 = vld [vmem:[%s720_s5 + $0x28] sm:$0xff]  ;;  %v374_v36 = vld [vmem:[%s720_s5 + $0x18] sm:$0xff] }
  0x16   : > { %351 = vmatpush.msra.mxu1 %v336_v8  ;;  %393 = vmatpush.msrb.mxu0 %v384_v22  ;;  %v375_v34 = vld [vmem:[%s720_s5 + $0x20] sm:$0xff]  ;;  %v373_v40 = vld [vmem:[%s720_s5 + $0x10] sm:$0xff]  ;;  %v372_v41 = vld [vmem:[%s720_s5 + $0x8] sm:$0xff] }
  0x17   : > { %492 = vmatpush.msra.mxu3 %v336_v8  ;;  %484 = vmatmul.msk.f32.gmra.mxu0 %vm290_vm1, %v283_v10  ;;  %v371_v42 = vld [vmem:[%s720_s5] sm:$0xff] }
  0x18   : > { %352 = vmatpush.msra.mxu1 %v335_v9  ;;  %505 = vmatpush.msra.mxu2 %v384_v22  ;;  %v528_v43 = vld [vmem:[%s719_s4] ss:$0 sm:$0xff] }
  0x19   : > { %493 = vmatpush.msra.mxu3 %v335_v9  ;;  %394 = vmatpush.msrb.mxu0 %v383_v23  ;;  %v529_v50 = vld [vmem:[%s721_s6] ss:$0 sm:$0xff] }
  0x1a   : > { %353 = vmatpush.msra.mxu1 %v334_v11  ;;  %506 = vmatpush.msra.mxu2 %v383_v23 }
  0x1b   : > { %494 = vmatpush.msra.mxu3 %v334_v11  ;;  %395 = vmatpush.msrb.mxu0 %v382_v24 }
  0x1c   : > { %354 = vmatpush.msra.mxu1 %v333_v12  ;;  %507 = vmatpush.msra.mxu2 %v382_v24 }
  0x1d   : > { %495 = vmatpush.msra.mxu3 %v333_v12  ;;  %396 = vmatpush.msrb.mxu0 %v381_v25 }
  0x1e   : > { %355 = vmatpush.msra.mxu1 %v332_v13  ;;  %508 = vmatpush.msra.mxu2 %v381_v25 }
  0x1f   : > { %496 = vmatpush.msra.mxu3 %v332_v13  ;;  %397 = vmatpush.msrb.mxu0 %v380_v26 }
  0x20   : > { %356 = vmatpush.msra.mxu1 %v331_v14  ;;  %509 = vmatpush.msra.mxu2 %v380_v26 }
  0x21   : > { %497 = vmatpush.msra.mxu3 %v331_v14  ;;  %398 = vmatpush.msrb.mxu0 %v379_v27 }
  0x22   : > { %357 = vmatpush.msra.mxu1 %v330_v15  ;;  %510 = vmatpush.msra.mxu2 %v379_v27 }
  0x23   : > { %498 = vmatpush.msra.mxu3 %v330_v15  ;;  %399 = vmatpush.msrb.mxu0 %v378_v28 }
  0x24   : > { %358 = vmatpush.msra.mxu1 %v329_v16  ;;  %511 = vmatpush.msra.mxu2 %v378_v28 }
  0x25   : > { %499 = vmatpush.msra.mxu3 %v329_v16  ;;  %400 = vmatpush.msrb.mxu0 %v377_v30 }
  0x26   : > { %359 = vmatpush.msra.mxu1 %v328_v17  ;;  %512 = vmatpush.msra.mxu2 %v377_v30 }
  0x27   : > { %500 = vmatpush.msra.mxu3 %v328_v17  ;;  %401 = vmatpush.msrb.mxu0 %v376_v31 }
  0x28   : > { %360 = vmatpush.msra.mxu1 %v327_v18  ;;  %513 = vmatpush.msra.mxu2 %v376_v31 }
  0x29   : > { %501 = vmatpush.msra.mxu3 %v327_v18  ;;  %402 = vmatpush.msrb.mxu0 %v375_v34 }
  0x2a   : > { %361 = vmatpush.msra.mxu1 %v326_v19  ;;  %514 = vmatpush.msra.mxu2 %v375_v34 }
  0x2b   : > { %502 = vmatpush.msra.mxu3 %v326_v19  ;;  %403 = vmatpush.msrb.mxu0 %v374_v36 }
  0x2c   : > { %515 = vmatpush.msra.mxu2 %v374_v36 }
  0x2d   : > { %404 = vmatpush.msrb.mxu0 %v373_v40 }
  0x2e   : > { %516 = vmatpush.msra.mxu2 %v373_v40 }
  0x2f   : > { %405 = vmatpush.msrb.mxu0 %v372_v41 }
  0x30   : > { %517 = vmatpush.msra.mxu2 %v372_v41 }
  0x31   : > { %406 = vmatpush.msrb.mxu0 %v371_v42 }
  0x32   : > { %518 = vmatpush.msra.mxu2 %v371_v42 }
  0x8c   : > { %v318_v32 = vpop.f32.mrf.mxu0 }
  0x8d   : > { %v319_v33 = vadd.f32 %v527_v29, %v318_v32 }
  0x8f   : > { %v324_v35 = vmax.f32 %v319_v33, 0.0 }
  0x91   : > { %362 = vmatmul.f32.vlgmr.msra.gmra.mxu1 %v324_v35 }
  0x94   : > { %v321_v37 = vpop.f32.mrf.mxu0 }
  0x95   : > { %v322_v38 = vadd.f32 %v527_v29, %v321_v37 }
  0x97   : > { %v325_v39 = vmax.f32 %v322_v38, 0.0 }
  0x99   : > { %365 = vmatmul.f32.vlgmr.msra.gmra.mxu3 %v325_v39 }
 0x10e   : > { %v363_v44 = vpop.f32.mrf.mxu1 }
 0x10f   : > { %v364_v45 = vadd.f32 %v528_v43, %v363_v44 }
 0x111   : > { %v369_v46 = vmax.f32 %v364_v45, 0.0 }
 0x113   : > { %407 = vmatmul.f32.vlgmr.msrb.gmra.mxu0 %v369_v46 }
 0x11c   : > { %v366_v47 = vpop.f32.mrf.mxu3 }
 0x11d   : > { %v367_v48 = vadd.f32 %v528_v43, %v366_v47 }
 0x11f   : > { %v370_v49 = vmax.f32 %v367_v48, 0.0 }
 0x121   : > { %410 = vmatmul.f32.vlgmr.msra.gmra.mxu2 %v370_v49 }
 0x190   : > { %v408_v51 = vpop.f32.mrf.mxu0 }
 0x191   : > { %v409_v52 = vadd.f32 %v529_v50, %v408_v51 }
 0x193   : > { %415 = vst.msk [vmem:[%s280_s25] sm:$0xff] %vm414_vm2, %v409_v52 }
 0x1a4   : > { %v411_v53 = vpop.f32.mrf.mxu2 }
 0x1a5   : > { %v412_v54 = vadd.f32 %v529_v50, %v411_v53 }
 0x1a7   : > { %416 = vst.msk [vmem:[%s280_s25 + $0x8] sm:$0xff] %vm414_vm2, %v412_v54 }
 0x1a8 PF: > { %s17_s24 = sadd.s32 1, %s536_s24  }
 0x1a9   : > { %p14_p4 = scmp.ge.s32.totalorder %s17_s24, 4  }
 0x1ab   :  { %16 = sbr.rel (!%p14_p4) target bundleno = 1 (0x1), region = 78 }

</bundles_post_ra>
